<compile_context>
chip_gen: v6e
topology: v6e:2x2x1
jax: 0.10.0
libtpu: 0.0.40
codegen_flags: <defaults>
</compile_context>

<pallas_src>
import functools

import numpy as np
import jax
import jax.numpy as jnp
from jax.experimental import pallas as pl
from jax.experimental.pallas import tpu as pltpu

# ------------------------- problem sizes (small demo) -------------------------
N = 2          # batch
C_IN = 8       # input channels   (sublanes)
C_OUT = 16     # output channels
L = 128        # sequence length  (lanes -> lane-dense output stores)
K = 3          # kernel size
DIL = 2        # dilation


def _causal_conv1d_kernel(x_ref, w_ref, b_ref, o_ref, *, n_batch, ksize, dilation):
    """x_ref: (N, C_in, L); w_ref: (C_out, K*C_in); b_ref: (C_out, 1);
    o_ref: (N, C_out, L)."""
    c_in, seq = x_ref.shape[1], x_ref.shape[2]
    w = w_ref[...]                                    # (C_out, K*C_in)
    b = b_ref[...]                                    # (C_out, 1) -> bcast over lanes
    lane = jax.lax.broadcasted_iota(jnp.int32, (c_in, seq), 1)

    for n in range(n_batch):                          # static unroll, N is tiny
        x = x_ref[n]                                  # (C_in, L)
        taps = []
        for k in range(ksize):                        # static unroll over taps
            shift = (ksize - 1 - k) * dilation        # causal: tap k reads x[t-shift]
            if shift == 0:
                taps.append(x)
            else:
                xs = pltpu.roll(x, shift=shift, axis=1)          # lane rotate (XLU)
                taps.append(jnp.where(lane >= shift, xs, 0.0))   # zero wrapped lanes
        xcol = jnp.concatenate(taps, axis=0)          # (K*C_in, L) im2col stack
        y = jnp.dot(w, xcol, preferred_element_type=jnp.float32)  # one MXU matmul
        o_ref[n] = (y + b).astype(o_ref.dtype)        # lane-dense store (L lanes)


def causal_conv1d_pallas(x, weight, bias, *, dilation=1):
    """x: (N, C_in, L) f32; weight: (C_out, C_in, K) PyTorch layout; bias: (C_out,)."""
    n, c_in, seq = x.shape
    c_out, c_in_w, ksize = weight.shape
    assert c_in_w == c_in
    assert (ksize - 1) * dilation < seq, "receptive-field pad exceeds sequence length"

    # (C_out, C_in, K) -> (C_out, K, C_in) -> (C_out, K*C_in); column k*C_in + i
    # matches the in-kernel im2col stacking order (tap-major, channel-minor).
    w_flat = jnp.transpose(weight, (0, 2, 1)).reshape(c_out, ksize * c_in)
    b_col = bias.reshape(c_out, 1)

    kernel = functools.partial(
        _causal_conv1d_kernel, n_batch=n, ksize=ksize, dilation=dilation)

    return pl.pallas_call(
        kernel,
        out_shape=jax.ShapeDtypeStruct((n, c_out, seq), x.dtype),
        in_specs=[pl.BlockSpec(memory_space=pltpu.MemorySpace.VMEM)] * 3,
        out_specs=pl.BlockSpec(memory_space=pltpu.MemorySpace.VMEM),
    )(x, w_flat, b_col)


# ------------------------- pure-JAX reference (PyTorch semantics) -------------------------
def causal_conv1d_ref(x, weight, bias, *, dilation=1):
    """Mirrors CausalConv1d.forward: Conv1d with padding=(K-1)*dilation on both
    sides, then crop the trailing pad (=> causal)."""
    ksize = weight.shape[-1]
    pad = (ksize - 1) * dilation
    y = jax.lax.conv_general_dilated(
        x, weight,
        window_strides=(1,),
        padding=[(pad, pad)],
        rhs_dilation=(dilation,),
        dimension_numbers=("NCH", "OIH", "NCH"),
        precision=jax.lax.Precision.HIGHEST,
    )
    y = y + bias[None, :, None]
    if pad > 0:
        y = y[..., :-pad]
    return y


if __name__ == "__main__":
    key = jax.random.PRNGKey(0)
    kx, kw, kb = jax.random.split(key, 3)
    x = jax.random.normal(kx, (N, C_IN, L), jnp.float32)             # NCL, like PyTorch
    weight = 0.2 * jax.random.normal(kw, (C_OUT, C_IN, K), jnp.float32)
    bias = 0.1 * jax.random.normal(kb, (C_OUT,), jnp.float32)

    out = causal_conv1d_pallas(x, weight, bias, dilation=DIL)
    out = jax.block_until_ready(out)

    ref = causal_conv1d_ref(x, weight, bias, dilation=DIL)
    np.testing.assert_allclose(np.asarray(out), np.asarray(ref), rtol=1e-4, atol=1e-4)
    print("KERNEL_OK")
</pallas_src>

<mosaic_0001>
module attributes {stable_mosaic.version = 11 : i64} {
  func.func @_causal_conv1d_kernel(%arg0: memref<2x8x128xf32, #tpu.memory_space<vmem>>, %arg1: memref<16x24xf32, #tpu.memory_space<vmem>>, %arg2: memref<16x1xf32, #tpu.memory_space<vmem>>, %arg3: memref<2x16x128xf32, #tpu.memory_space<vmem>>) attributes {dimension_semantics = [], scalar_prefetch = 0 : i64, scratch_operands = 0 : i64, tpu.core_type = #tpu.core_type<tc>} {
    %c0 = arith.constant 0 : index
    %c0_0 = arith.constant 0 : index
    %0 = vector.load %arg1[%c0, %c0_0] : memref<16x24xf32, #tpu.memory_space<vmem>>, vector<16x24xf32>
    %c0_1 = arith.constant 0 : index
    %c0_2 = arith.constant 0 : index
    %1 = vector.load %arg2[%c0_1, %c0_2] : memref<16x1xf32, #tpu.memory_space<vmem>>, vector<16x1xf32>
    %2 = tpu.iota {dimensions = array<i32: 1>} : vector<8x128xi32>
    %c0_3 = arith.constant 0 : index
    %c0_4 = arith.constant 0 : index
    %c0_5 = arith.constant 0 : index
    %3 = vector.load %arg0[%c0_3, %c0_4, %c0_5] : memref<2x8x128xf32, #tpu.memory_space<vmem>>, vector<1x8x128xf32>
    %4 = vector.shape_cast %3 : vector<1x8x128xf32> to vector<8x128xf32>
    %c4_i32 = arith.constant 4 : i32
    %5 = tpu.dynamic_rotate %4 by %c4_i32 dim 1 : vector<8x128xf32>, i32 -> vector<8x128xf32>
    %c4_i32_6 = arith.constant 4 : i32
    %6 = vector.broadcast %c4_i32_6 : i32 to vector<8x128xi32>
    %7 = arith.cmpi sge, %2, %6 : vector<8x128xi32>
    %cst = arith.constant 0.000000e+00 : f32
    %8 = vector.broadcast %cst : f32 to vector<8x128xf32>
    %9 = arith.select %7, %5, %8 : vector<8x128xi1>, vector<8x128xf32>
    %c2_i32 = arith.constant 2 : i32
    %10 = tpu.dynamic_rotate %4 by %c2_i32 dim 1 : vector<8x128xf32>, i32 -> vector<8x128xf32>
    %c2_i32_7 = arith.constant 2 : i32
    %11 = vector.broadcast %c2_i32_7 : i32 to vector<8x128xi32>
    %12 = arith.cmpi sge, %2, %11 : vector<8x128xi32>
    %cst_8 = arith.constant 0.000000e+00 : f32
    %13 = vector.broadcast %cst_8 : f32 to vector<8x128xf32>
    %14 = arith.select %12, %10, %13 : vector<8x128xi1>, vector<8x128xf32>
    %15 = tpu.concatenate %9, %14, %4 in 0 : vector<8x128xf32>, vector<8x128xf32>, vector<8x128xf32> -> vector<24x128xf32>
    %cst_9 = arith.constant dense<0.000000e+00> : vector<16x128xf32>
    %16 = tpu.matmul %0, %15, %cst_9 {dimension_numbers = #tpu.dot_dimension_numbers<[1], [0], [0], [1], [0, 0, 1, 1], [], []>} : vector<16x24xf32>, vector<24x128xf32>, vector<16x128xf32> -> vector<16x128xf32>
    %17 = vector.broadcast %1 : vector<16x1xf32> to vector<16x128xf32>
    %18 = arith.addf %16, %17 : vector<16x128xf32>
    %c0_10 = arith.constant 0 : index
    %c0_11 = arith.constant 0 : index
    %c0_12 = arith.constant 0 : index
    %19 = vector.load %arg3[%c0_10, %c0_11, %c0_12] : memref<2x16x128xf32, #tpu.memory_space<vmem>>, vector<1x16x128xf32>
    %20 = vector.shape_cast %19 : vector<1x16x128xf32> to vector<16x128xf32>
    %21 = vector.shape_cast %18 : vector<16x128xf32> to vector<1x16x128xf32>
    tpu.vector_store %arg3[%c0_10, %c0_11, %c0_12], %21 {strides = array<i32>} : memref<2x16x128xf32, #tpu.memory_space<vmem>>, vector<1x16x128xf32>,
    %c1 = arith.constant 1 : index
    %c0_13 = arith.constant 0 : index
    %c0_14 = arith.constant 0 : index
    %22 = vector.load %arg0[%c1, %c0_13, %c0_14] : memref<2x8x128xf32, #tpu.memory_space<vmem>>, vector<1x8x128xf32>
    %23 = vector.shape_cast %22 : vector<1x8x128xf32> to vector<8x128xf32>
    %c4_i32_15 = arith.constant 4 : i32
    %24 = tpu.dynamic_rotate %23 by %c4_i32_15 dim 1 : vector<8x128xf32>, i32 -> vector<8x128xf32>
    %c4_i32_16 = arith.constant 4 : i32
    %25 = vector.broadcast %c4_i32_16 : i32 to vector<8x128xi32>
    %26 = arith.cmpi sge, %2, %25 : vector<8x128xi32>
    %cst_17 = arith.constant 0.000000e+00 : f32
    %27 = vector.broadcast %cst_17 : f32 to vector<8x128xf32>
    %28 = arith.select %26, %24, %27 : vector<8x128xi1>, vector<8x128xf32>
    %c2_i32_18 = arith.constant 2 : i32
    %29 = tpu.dynamic_rotate %23 by %c2_i32_18 dim 1 : vector<8x128xf32>, i32 -> vector<8x128xf32>
    %c2_i32_19 = arith.constant 2 : i32
    %30 = vector.broadcast %c2_i32_19 : i32 to vector<8x128xi32>
    %31 = arith.cmpi sge, %2, %30 : vector<8x128xi32>
    %cst_20 = arith.constant 0.000000e+00 : f32
    %32 = vector.broadcast %cst_20 : f32 to vector<8x128xf32>
    %33 = arith.select %31, %29, %32 : vector<8x128xi1>, vector<8x128xf32>
    %34 = tpu.concatenate %28, %33, %23 in 0 : vector<8x128xf32>, vector<8x128xf32>, vector<8x128xf32> -> vector<24x128xf32>
    %cst_21 = arith.constant dense<0.000000e+00> : vector<16x128xf32>
    %35 = tpu.matmul %0, %34, %cst_21 {dimension_numbers = #tpu.dot_dimension_numbers<[1], [0], [0], [1], [0, 0, 1, 1], [], []>} : vector<16x24xf32>, vector<24x128xf32>, vector<16x128xf32> -> vector<16x128xf32>
    %36 = vector.broadcast %1 : vector<16x1xf32> to vector<16x128xf32>
    %37 = arith.addf %35, %36 : vector<16x128xf32>
    %c1_22 = arith.constant 1 : index
    %c0_23 = arith.constant 0 : index
    %c0_24 = arith.constant 0 : index
    %38 = vector.load %arg3[%c1_22, %c0_23, %c0_24] : memref<2x16x128xf32, #tpu.memory_space<vmem>>, vector<1x16x128xf32>
    %39 = vector.shape_cast %38 : vector<1x16x128xf32> to vector<16x128xf32>
    %40 = vector.shape_cast %37 : vector<16x128xf32> to vector<1x16x128xf32>
    tpu.vector_store %arg3[%c1_22, %c0_23, %c0_24], %40 {strides = array<i32>} : memref<2x16x128xf32, #tpu.memory_space<vmem>>, vector<1x16x128xf32>,
    return
  }
}

</mosaic_0001>

<bundles_post_ra>
// kernel: tpu_custom_call.1
= control target key start
LH: loop header
LB: loop body
LE: loop exit
PB: predicated region body
PF: predicated region fallthrough
CT: control target
= control target key end

     0   :  { %8 = vsyncpa [#allocation3], 0  ;;  %s386_s0 = inlined_call_operand.vmem [shape: f32[2,8,128], index: 0, kind: input, shape index: {}]   ;;  %s387_s1 = inlined_call_operand.hbm [shape: f32[16,24], index: 1, kind: input, shape index: {}]   ;;  %s388_s2 = inlined_call_operand.vmem [shape: f32[16,1], index: 2, kind: input, shape index: {}]   ;;  %s389_s3 = inlined_call_operand.hbm [shape: f32[2,16,128], index: 3, kind: output, shape index: {}]  }
   0x1   :  { %9 = vsyncpa [#allocation4], 0  ;;  %s331_s12 = smov [#allocation2]  }
   0x2   :  { %s17_s13 = sshll.u32 %s331_s12, 4  ;;  %s18_s13 = int_to_ptr.vmem [resolvable:$true] %s17_s13 }
   0x3   :  { %s295_s14 = scalar_lea.vmem %s18_s13, 256  ;;  %p300_p1 = scmp.lt.s32.totalorder %s18_s13, %s18_s13 }
   0x4   :  { %p296_p0 = scmp.ne.s32.totalorder %s18_s13, %s295_s14  ;;  %p301_p2 = scmp.lt.s32.totalorder %s295_s14, %s295_s14 }
   0x6   :  { %p302_p3 = por %p301_p2, %p300_p1 }
   0x8   :  { %p303_p4 = pnand %p302_p3, %p296_p0 }
   0xa   :  { %306 = shalt.err (!%p303_p4)
}
   0xb   :  { %s332_s15 = smov 128   ;;  %s333_s16 = smov 8  }
   0xc   :  { %23 = dma.hbm_to_vmem [thread:$0]  %s387_s1, 256, %s18_s13, [#allocation3], %s332_s15, %s332_s15, %s333_s16  }
   0xd   :  { %327 = dma.done.wait [#allocation3], 256  }
   0xe   :  { %328 = vsyncadd [#allocation3], 4294967040  ;;  %v334_v0 = vmov 0   ;;  %v35_v1 = vld [vmem:[%s386_s0] sm:$0xff]  ;;  %s335_s21 = smov 2   ;;  %s336_s22 = smov 4   ;;  %v33_v6 = vlaneseq }
   0xf   :  { %286 = vset.pattern.permute.xlu1 %v334_v0  ;;  %285 = vset.pattern.permute.xlu0 %v334_v0  ;;  %v245_v2 = vld [vmem:[%s386_s0 + $0x8] sm:$0xff]  ;;  %v29_v3 = vld [vmem:[#allocation2] sm:$0xff]  ;;  %vm54_vm0 = vcmask 195584   ;;  %s337_s0 = smov [#allocation5]  }
  0x10   :  { %40 = vrot.lane.b32.xlu0 %v35_v1, %s335_s21  ;;  %36 = vrot.lane.b32.xlu1 %v35_v1, %s336_s22  ;;  %v32_v4 = vld [vmem:[%s388_s2 + $0x8] sm:$0xff]  ;;  %v31_v5 = vld [vmem:[%s388_s2] sm:$0xff]  ;;  %v34_v7 = vand.u32 127, %v33_v6  ;;  %s229_s2 = sshll.u32 %s337_s0, 4  ;;  %s230_s2 = int_to_ptr.vmem [resolvable:$true] %s229_s2 }
  0x11   :  { %260 = vmatprep.subr.mxu0 %v35_v1  ;;  %269 = vmatprep.subr.mxu1 %v245_v2  ;;  %v30_v10 = vld [vmem:[#allocation2 + $0x8] sm:$0xff]  ;;  %s307_s28 = scalar_lea.vmem %s230_s2, 512  ;;  %p312_p6 = scmp.lt.s32.totalorder %s230_s2, %s230_s2 }
  0x12   :  { %261 = vmatpush3.msra.mxu0 %v35_v1  ;;  %270 = vmatpush3.msra.mxu1 %v245_v2  ;;  %vm42_vm1 = vcmp.ge.s32.totalorder %v34_v7, 2  ;;  %vm38_vm2 = vcmp.ge.s32.totalorder %v34_v7, 4  ;;  %p308_p5 = scmp.ne.s32.totalorder %s230_s2, %s307_s28  ;;  %p313_p7 = scmp.lt.s32.totalorder %s307_s28, %s307_s28 }
  0x13   :  { %266 = vmatprep.mubr.msk.f32.mxu0 %vm54_vm0, %v29_v3  ;;  %275 = vmatprep.mubr.msk.f32.mxu1 %vm54_vm0, %v29_v3 }
  0x14   :  { %143 = vrot.lane.b32.xlu0 %v245_v2, %s335_s21  ;;  %140 = vrot.lane.b32.xlu1 %v245_v2, %s336_s22  ;;  %p314_p8 = por %p313_p7, %p312_p6 }
  0x16   :  { %p315_p9 = pnand %p314_p8, %p308_p5 }
  0x18   :  { %51 = vperm.xlu1 %286, %v32_v4   ;;  %46 = vperm.xlu0 %285, %v31_v5  }
  0x82   :  { %v41_v8 = vpop.permute.xlu0 %40  ;;  %v37_v9 = vpop.permute.xlu1 %36 }
  0x83   :  { %262 = vmatprep.subr.msk.mxu0 %vm42_vm1, %v41_v8 }
  0x84   :  { %263 = vmatpush3.msk.msra.mxu0 %vm42_vm1, %v41_v8 }
  0x85   :  { %264 = vmatprep.subr.msk.mxu0 %vm38_vm2, %v37_v9 }
  0x86   :  { %v144_v11 = vpop.permute.xlu0 %143  ;;  %265 = vmatpush3.msk.msra.mxu0 %vm38_vm2, %v37_v9  ;;  %v141_v12 = vpop.permute.xlu1 %140 }
  0x87   :  { %271 = vmatprep.subr.msk.mxu1 %vm42_vm1, %v144_v11  ;;  %267 = vmatmul.mubr.msk.f32.vlgmr.msra.gmra.mxu0 %vm54_vm0, %v30_v10 }
  0x88   :  { %272 = vmatpush3.msk.msra.mxu1 %vm42_vm1, %v144_v11 }
  0x89   :  { %273 = vmatprep.subr.msk.mxu1 %vm38_vm2, %v141_v12 }
  0x8a   :  { %274 = vmatpush3.msk.msra.mxu1 %vm38_vm2, %v141_v12 }
  0x8b   :  { %276 = vmatmul.mubr.msk.f32.vlgmr.msra.gmra.mxu1 %vm54_vm0, %v30_v10 }
  0x93   :  { %v52_v13 = vpop.permute.xlu1 %51  ;;  %v47_v15 = vpop.permute.xlu0 %46 }
 0x147   :  { %v268_v14 = vpop.f32.mrf.mxu0 }
 0x148   :  { %v133_v16 = vadd.f32 %v268_v14, %v52_v13 }
 0x149   :  { %v127_v17 = vpop.f32.mrf.mxu0 }
 0x14a   :  { %137 = vst [vmem:[#allocation5 + $0x8] sm:$0xff] %v133_v16  ;;  %v128_v18 = vadd.f32 %v127_v17, %v47_v15 }
 0x14b   :  { %v277_v19 = vpop.f32.mrf.mxu1 }
 0x14c   :  { %136 = vst [vmem:[#allocation5] sm:$0xff] %v128_v18  ;;  %v218_v20 = vadd.f32 %v277_v19, %v52_v13 }
 0x14d   :  { %v212_v21 = vpop.f32.mrf.mxu1 }
 0x14e   :  { %223 = vst [vmem:[#allocation5 + $0x18] sm:$0xff] %v218_v20  ;;  %v213_v22 = vadd.f32 %v212_v21, %v47_v15 }
 0x150   :  { %222 = vst [vmem:[#allocation5 + $0x10] sm:$0xff] %v213_v22 }
 0x151   :  { %318 = shalt.err (!%p315_p9)
}
 0x152   :  { %235 = dma.vmem_to_hbm [thread:$0]  %s230_s2, 512, %s389_s3, [#allocation4], %s332_s15, %s332_s15, %s333_s16  }
 0x153   :  { %329 = dma.done.wait [#allocation4], 512  }
 0x154   :  { %330 = vsyncadd [#allocation4], 4294966784 }
 0x155   :  { %239 = vsyncpa [#allocation3], 1 }
 0x156   :  { %240 = vsyncpa [#allocation4], 1 }

</bundles_post_ra>
